<compile_context>
chip_gen: v5e
topology: v5e:2x2
jax: 0.10.0
libtpu: 0.0.40
codegen_flags: <defaults>
</compile_context>

<pallas_src>
import functools

import jax
import jax.numpy as jnp
from jax.experimental import pallas as pl
from jax.experimental.pallas import tpu as pltpu


def _round_up(x, m):
    return (x + m - 1) // m * m


def _choose_row_tile(R, Lp):
    """Pick the row (sublane) tile: big for DMA efficiency, small enough for VMEM,
    and leaving >=2 grid steps for v7x megacore when there is enough work."""
    # Cap so one f32 (rows, Lp) block stays <= ~4 MiB
    cap = max(8, ((4 << 20) // (Lp * 4)) // 8 * 8)
    tr = max(8, min(_round_up(R, 8), cap))
    if R >= 16:  # keep at least 2 grid steps so megacore can shard the row axis
        tr = min(tr, max(8, ((R // 2) // 8) * 8))
    # limit row-padding waste to ~25% of the real rows
    while tr > 8 and _round_up(R, tr) - R > max(8, R // 4):
        tr -= 8
    return tr


def _firstblock_kernel(x_ref, w_ref, b_ref, a_ref, o_ref, *, kernel_size, dilation, pad):
    # x_ref : (TR, Lp)  rows of (batch*channel) x time
    # w_ref : (TR, K)   per-row depthwise conv weights
    # b_ref : (TR, 1)   per-row conv bias
    # a_ref : (TR, 1)   per-row PReLU alpha
    # o_ref : (TR, Lp)
    TR, Lp = o_ref.shape
    x = x_ref[...].astype(jnp.float32)
    w = w_ref[...].astype(jnp.float32)          # read the whole weight tile once
    lane = jax.lax.broadcasted_iota(jnp.int32, (TR, Lp), 1)

    # accumulator starts at the bias broadcast (saves the separate bias add)
    acc = jnp.broadcast_to(b_ref[...].astype(jnp.float32), (TR, Lp))

    # Causal depthwise conv: out[r, t] = b[r] + sum_j w[r, j] * x[r, t - (pad - j*dil)]
    # with out-of-range (t - shift < 0) taps treated as zero (the causal halo).
    for j in range(kernel_size):
        shift = pad - j * dilation              # >= 0 by construction
        if shift == 0:
            tap = x
        else:
            # pltpu.roll == jnp.roll: rolled[t] = x[t - shift]; mask the wrapped prefix.
            rolled = pltpu.roll(x, shift, axis=1)
            tap = jnp.where(lane >= shift, rolled, 0.0)
        acc = acc + w[:, j:j + 1] * tap

    alpha = a_ref[...].astype(jnp.float32)
    out = jnp.where(acc > 0, acc, alpha * acc)  # per-row (i.e. per-channel) PReLU
    o_ref[...] = out.astype(o_ref.dtype)


def first_block(x, weight, bias, alpha, *, kernel_size, dilation):
    """x: (B, C, L) f32. weight: (C, K). bias, alpha: (C,). Returns (B, C, L)."""
    B, C, L = x.shape
    K = kernel_size
    pad = (K - 1) * dilation                    # Conv1d(padding=pad) + Chomp1d(pad)

    R = B * C
    Lp = _round_up(L, 128)                      # lane-dense output (unmasked vst)
    TR = _choose_row_tile(R, Lp)
    Rp = _round_up(R, TR)

    # Flatten to rows; pad only when shapes don't tile evenly (no-op for aligned shapes).
    x2 = x.reshape(R, L)
    if (Rp, Lp) != (R, L):
        x2 = jnp.pad(x2, ((0, Rp - R), (0, Lp - L)))

    # Per-row parameters (tiny: R*(K+2) floats).
    w_rows = jnp.broadcast_to(weight[None], (B, C, K)).reshape(R, K)
    b_rows = jnp.broadcast_to(bias[None], (B, C)).reshape(R, 1)
    a_rows = jnp.broadcast_to(alpha[None], (B, C)).reshape(R, 1)
    if Rp != R:
        w_rows = jnp.pad(w_rows, ((0, Rp - R), (0, 0)))
        b_rows = jnp.pad(b_rows, ((0, Rp - R), (0, 0)))
        a_rows = jnp.pad(a_rows, ((0, Rp - R), (0, 0)))

    kern = functools.partial(_firstblock_kernel,
                             kernel_size=K, dilation=dilation, pad=pad)

    blk_bytes = TR * Lp * 4                     # one f32 block
    # double-buffered in + out blocks + params + margin; >= scoped defaults, fits v7x
    vmem_limit = max(32 << 20, 4 * blk_bytes + (4 << 20))

    out = pl.pallas_call(
        kern,
        out_shape=jax.ShapeDtypeStruct((Rp, Lp), x.dtype),
        grid_spec=pltpu.PrefetchScalarGridSpec(
            num_scalar_prefetch=0,
            grid=(Rp // TR,),
            in_specs=[
                pl.BlockSpec((TR, Lp), lambda i: (i, 0)),
                pl.BlockSpec((TR, K), lambda i: (i, 0)),
                pl.BlockSpec((TR, 1), lambda i: (i, 0)),
                pl.BlockSpec((TR, 1), lambda i: (i, 0)),
            ],
            out_specs=pl.BlockSpec((TR, Lp), lambda i: (i, 0)),
        ),
        compiler_params=pltpu.CompilerParams(
            dimension_semantics=("parallel",),
            vmem_limit_bytes=vmem_limit),
    )(x2, w_rows, b_rows, a_rows)

    if (Rp, Lp) != (R, L):
        out = out[:R, :L]
    return out.reshape(B, C, L)


def _reference(x, weight, bias, alpha, *, kernel_size, dilation):
    """Pure-JAX reference of the same forward pass (causal conv + bias + PReLU)."""
    B, C, L = x.shape
    pad = (kernel_size - 1) * dilation
    x_pad = jnp.pad(x, ((0, 0), (0, 0), (pad, 0)))
    out = jnp.zeros((B, C, L), jnp.float32)
    for j in range(kernel_size):
        out = out + weight[None, :, j:j + 1] * x_pad[:, :, j * dilation:j * dilation + L]
    out = out + bias[None, :, None]
    return jnp.where(out > 0, out, alpha[None, :, None] * out)


if __name__ == "__main__":
    # Module hyperparameters. groups=n_outputs with Conv1d requires
    # n_inputs == n_outputs (depthwise), so C_in == C_out == C.
    C = 8            # n_inputs == n_outputs
    K = 3            # kernel_size
    STRIDE = 1
    DIL = 2          # dilation
    PAD = (K - 1) * DIL
    B, L = 2, 128    # batch, sequence length

    key = jax.random.PRNGKey(0)
    kx, kw, kb = jax.random.split(key, 3)

    x = jax.random.normal(kx, (B, C, L), dtype=jnp.float32)
    # conv1.weight.data.normal_(0, 0.1); weight shape (C_out, C_in/groups=1, K) -> (C, K)
    weight = 0.1 * jax.random.normal(kw, (C, K), dtype=jnp.float32)
    # Conv1d bias (deterministic synthetic values here)
    bias = 0.05 * jax.random.normal(kb, (C,), dtype=jnp.float32)
    # nn.PReLU(n_inputs) init: alpha = 0.25 per channel
    alpha = jnp.full((C,), 0.25, dtype=jnp.float32)

    out = first_block(x, weight, bias, alpha, kernel_size=K, dilation=DIL)
    out = jax.block_until_ready(out)

    ref = _reference(x, weight, bias, alpha, kernel_size=K, dilation=DIL)
    assert out.shape == (B, C, L)
    assert jnp.allclose(out, ref, atol=1e-5, rtol=1e-5)

    print("KERNEL_OK")
</pallas_src>

<mosaic_0001>
module attributes {stable_mosaic.version = 11 : i64} {
  func.func @_firstblock_kernel(%arg0: i32, %arg1: memref<8x128xf32, #tpu.memory_space<vmem>>, %arg2: memref<8x3xf32, #tpu.memory_space<vmem>>, %arg3: memref<8x1xf32, #tpu.memory_space<vmem>>, %arg4: memref<8x1xf32, #tpu.memory_space<vmem>>, %arg5: memref<8x128xf32, #tpu.memory_space<vmem>>) attributes {dimension_semantics = [#tpu.dimension_semantics<parallel>], iteration_bounds = array<i64: 2>, scalar_prefetch = 0 : i64, scratch_operands = 0 : i64, tpu.core_type = #tpu.core_type<tc>, window_params = [{transform_indices = @transform_0, window_bounds = array<i64: 8, 128>}, {transform_indices = @transform_1, window_bounds = array<i64: 8, 3>}, {transform_indices = @transform_2, window_bounds = array<i64: 8, 1>}, {transform_indices = @transform_3, window_bounds = array<i64: 8, 1>}, {transform_indices = @transform_4, window_bounds = array<i64: 8, 128>}]} {
    %c0 = arith.constant 0 : index
    %c0_0 = arith.constant 0 : index
    %0 = vector.load %arg1[%c0, %c0_0] : memref<8x128xf32, #tpu.memory_space<vmem>>, vector<8x128xf32>
    %c0_1 = arith.constant 0 : index
    %c0_2 = arith.constant 0 : index
    %1 = vector.load %arg2[%c0_1, %c0_2] : memref<8x3xf32, #tpu.memory_space<vmem>>, vector<8x3xf32>
    %2 = tpu.iota {dimensions = array<i32: 1>} : vector<8x128xi32>
    %c0_3 = arith.constant 0 : index
    %c0_4 = arith.constant 0 : index
    %3 = vector.load %arg3[%c0_3, %c0_4] : memref<8x1xf32, #tpu.memory_space<vmem>>, vector<8x1xf32>
    %4 = vector.shape_cast %3 : vector<8x1xf32> to vector<8x1xf32>
    %5 = vector.broadcast %4 : vector<8x1xf32> to vector<8x128xf32>
    %c4_i32 = arith.constant 4 : i32
    %6 = tpu.dynamic_rotate %0 by %c4_i32 dim 1 : vector<8x128xf32>, i32 -> vector<8x128xf32>
    %c4_i32_5 = arith.constant 4 : i32
    %7 = vector.broadcast %c4_i32_5 : i32 to vector<8x128xi32>
    %8 = arith.cmpi sge, %2, %7 : vector<8x128xi32>
    %cst = arith.constant 0.000000e+00 : f32
    %9 = vector.broadcast %cst : f32 to vector<8x128xf32>
    %10 = arith.select %8, %6, %9 : vector<8x128xi1>, vector<8x128xf32>
    %11 = vector.extract_strided_slice %1 {offsets = [0, 0], sizes = [8, 1], strides = [1, 1]} : vector<8x3xf32> to vector<8x1xf32>
    %12 = vector.broadcast %11 : vector<8x1xf32> to vector<8x128xf32>
    %13 = arith.mulf %12, %10 : vector<8x128xf32>
    %14 = arith.addf %5, %13 : vector<8x128xf32>
    %c2_i32 = arith.constant 2 : i32
    %15 = tpu.dynamic_rotate %0 by %c2_i32 dim 1 : vector<8x128xf32>, i32 -> vector<8x128xf32>
    %c2_i32_6 = arith.constant 2 : i32
    %16 = vector.broadcast %c2_i32_6 : i32 to vector<8x128xi32>
    %17 = arith.cmpi sge, %2, %16 : vector<8x128xi32>
    %cst_7 = arith.constant 0.000000e+00 : f32
    %18 = vector.broadcast %cst_7 : f32 to vector<8x128xf32>
    %19 = arith.select %17, %15, %18 : vector<8x128xi1>, vector<8x128xf32>
    %20 = vector.extract_strided_slice %1 {offsets = [0, 1], sizes = [8, 1], strides = [1, 1]} : vector<8x3xf32> to vector<8x1xf32>
    %21 = vector.broadcast %20 : vector<8x1xf32> to vector<8x128xf32>
    %22 = arith.mulf %21, %19 : vector<8x128xf32>
    %23 = arith.addf %14, %22 : vector<8x128xf32>
    %24 = vector.extract_strided_slice %1 {offsets = [0, 2], sizes = [8, 1], strides = [1, 1]} : vector<8x3xf32> to vector<8x1xf32>
    %25 = vector.broadcast %24 : vector<8x1xf32> to vector<8x128xf32>
    %26 = arith.mulf %25, %0 : vector<8x128xf32>
    %27 = arith.addf %23, %26 : vector<8x128xf32>
    %c0_8 = arith.constant 0 : index
    %c0_9 = arith.constant 0 : index
    %28 = vector.load %arg4[%c0_8, %c0_9] : memref<8x1xf32, #tpu.memory_space<vmem>>, vector<8x1xf32>
    %cst_10 = arith.constant 0.000000e+00 : f32
    %29 = vector.broadcast %cst_10 : f32 to vector<8x128xf32>
    %30 = arith.cmpf ogt, %27, %29 : vector<8x128xf32>
    %31 = vector.broadcast %28 : vector<8x1xf32> to vector<8x128xf32>
    %32 = arith.mulf %31, %27 : vector<8x128xf32>
    %33 = arith.select %30, %27, %32 : vector<8x128xi1>, vector<8x128xf32>
    %c0_11 = arith.constant 0 : index
    %c0_12 = arith.constant 0 : index
    %34 = vector.load %arg5[%c0_11, %c0_12] : memref<8x128xf32, #tpu.memory_space<vmem>>, vector<8x128xf32>
    tpu.vector_store %arg5[%c0_11, %c0_12], %33 {strides = array<i32>} : memref<8x128xf32, #tpu.memory_space<vmem>>, vector<8x128xf32>,
    return
  }
  func.func @transform_0(%arg0: i32) -> (i32, i32) {
    %c0_i32 = arith.constant 0 : i32
    %c0_i32_0 = arith.constant 0 : i32
    return %arg0, %c0_i32 : i32, i32
  }
  func.func @transform_1(%arg0: i32) -> (i32, i32) {
    %c0_i32 = arith.constant 0 : i32
    %c0_i32_0 = arith.constant 0 : i32
    return %arg0, %c0_i32 : i32, i32
  }
  func.func @transform_2(%arg0: i32) -> (i32, i32) {
    %c0_i32 = arith.constant 0 : i32
    %c0_i32_0 = arith.constant 0 : i32
    return %arg0, %c0_i32 : i32, i32
  }
  func.func @transform_3(%arg0: i32) -> (i32, i32) {
    %c0_i32 = arith.constant 0 : i32
    %c0_i32_0 = arith.constant 0 : i32
    return %arg0, %c0_i32 : i32, i32
  }
  func.func @transform_4(%arg0: i32) -> (i32, i32) {
    %c0_i32 = arith.constant 0 : i32
    %c0_i32_0 = arith.constant 0 : i32
    return %arg0, %c0_i32 : i32, i32
  }
}

</mosaic_0001>

<bundles_post_ra>
// kernel: tpu_custom_call.1
= control target key start
LH: loop header
LB: loop body
LE: loop exit
PB: predicated region body
PF: predicated region fallthrough
CT: control target
= control target key end

     0   :  { %9 = vsyncpa [#allocation3], 0  ;;  %s651_s0 = inlined_call_operand.vmem [shape: f32[16,128], index: 0, kind: input, shape index: {}]   ;;  %s652_s1 = inlined_call_operand.vmem [shape: f32[16,3], index: 1, kind: input, shape index: {}]   ;;  %s653_s2 = inlined_call_operand.vmem [shape: f32[16,1], index: 2, kind: input, shape index: {}]   ;;  %s654_s3 = inlined_call_operand.vmem [shape: f32[16,1], index: 3, kind: input, shape index: {}]   ;;  %s655_s4 = inlined_call_operand.hbm [shape: f32[16,128], index: 4, kind: output, shape index: {}]  }
   0x1   :  { %11 = vsyncpa [#allocation3 + $0x1], 0  ;;  %s557_s15 = smov 0   ;;  %s559_s16 = smov 0  }
   0x2   :  { %s561_s17 = smov 0   ;;  %s563_s18 = smov 0  }
   0x3 LB: > { %s578_s19 = sadd.s32 4294967295, %s525_s18   ;;  %s402_s20 = sadd.s32 4294967294, %s525_s18   ;;  %s525_s18 = sphi %s563_s18, %s661_s18   ;;  %s521_s17 = sphi %s561_s17, %s660_s17   ;;  %s517_s16 = sphi %s559_s16, %s659_s16   ;;  %s513_s15 = sphi %s557_s15, %s658_s15  }
   0x4   : > { %s582_s21 = sadd.s32 1, %s525_s18   ;;  %s128_s22 = sadd.s32 1, %s521_s17 }
   0x5   : > { %s125_s23 = ssub.s32 %s525_s18, %s582_s21  ;;  %p138_p0 = scmp.ne.s32.totalorder %s521_s17, %s517_s16 }
   0x6   : > { %p126_p1 = scmp.eq.s32.totalorder %s125_s23, 0  ;;  %p139_p2 = scmp.eq.s32.totalorder %s578_s19, 1 }
   0x7   : > { %p144_p3 = scmp.ne.s32.totalorder %s517_s16, %s513_s15  ;;  %p145_p4 = scmp.eq.s32.totalorder %s402_s20, 1 }
   0x8   : > { %s593_s24 = scalar_select %p126_p1, %s521_s17, %s128_s22  }
   0x9   : > { %p595_p5 = por %p139_p2, %p138_p0  ;;  %p599_p6 = por %p145_p4, %p144_p3 }
   0xa   : > { %p405_p7 = scmp.ge.s32.totalorder %s525_s18, 1  ;;  %p191_p8 = scmp.lt.s32.totalorder %s525_s18, 3 }
   0xc   : > { %p192_p9 = pnand %p405_p7, %p191_p8 }
   0xd   : > { %p228_p10 = scmp.lt.s32.totalorder (!%p192_p9), %s578_s19, 1  ;;  %s529_s9 = smov (!%p192_p9), 2  }
   0xe   : > { %195 = sbr.rel (%p192_p9) target bundleno = 161 (0xa1), region = 36  ;;  %s530_s10 = smov (!%p192_p9), 4  }
   0xf   : > { %s225_s23 = sand.u32 (!%p192_p9), 1, %s517_s16  }
  0x13   : > { %v527_v0 = vmov 0   ;;  %s229_s27 = scalar_select %p228_p10, %s578_s19, 1  ;;  %v528_v1 = vmov 1   ;;  %v531_v5 = vmov 2   ;;  %v246_v7 = vlaneseq }
  0x14   : > { %460 = vset.pattern.permute.xlu1 %v527_v0  ;;  %459 = vset.pattern.permute.xlu0 %v527_v0 }
  0x15   : > { %461 = vset.pattern.permute.xlu2 %v528_v1  ;;  %s407_s28 = sshll.u32 %s229_s27, 3  ;;  %v247_v11 = vand.u32 127, %v246_v7  ;;  %s406_s27 = sshll.u32 %s225_s23, 3 }
  0x16   : > { %s231_s5 = scalar_lea.vmem %s651_s0, %s407_s28  ;;  %s235_s8 = scalar_lea.vmem %s652_s1, %s407_s28 }
  0x17   : > { %v244_v2 = vld [vmem:[%s231_s5] sm:$0xff]  ;;  %s239_s13 = scalar_lea.vmem %s653_s2, %s407_s28  ;;  %s243_s22 = scalar_lea.vmem %s654_s3, %s407_s28  ;;  %vm267_vm0 = vcmp.ge.s32.totalorder %v247_v11, 2  ;;  %vm256_vm1 = vcmp.ge.s32.totalorder %v247_v11, 4 }
  0x18   : > { %265 = vrot.lane.b32.xlu1 %v244_v2, %s529_s9  ;;  %254 = vrot.lane.b32.xlu0 %v244_v2, %s530_s10  ;;  %v245_v3 = vld [vmem:[%s235_s8] sm:$0xff]  ;;  %s412_s28 = sshll.u32 %s578_s19, 3  ;;  %s227_s6 = scalar_lea.vmem [#allocation2], %s406_s27 }
  0x19   : > { %270 = vperm.xlu2 %461, %v245_v3   ;;  %v248_v4 = vld [vmem:[%s239_s13] sm:$0xff]  ;;  %s302_s5 = scalar_lea.hbm %s655_s4, %s412_s28  ;;  %s304_s7 = sshll.u32 %s227_s6, 4  ;;  %s305_s7 = int_to_ptr.vmem [resolvable:$true] %s304_s7 }
  0x1a   : > { %v281_v6 = vld [vmem:[%s243_s22] sm:$0xff]  ;;  %s306_s8 = sshll.u32 %s302_s5, 4  ;;  %s292_s19 = scalar_lea.sflag [#allocation3], %s225_s23  ;;  %s307_s8 = int_to_ptr.hbm [resolvable:$true] %s306_s8 }
  0x1b   : > { %s477_s9 = sshra.s32 %s307_s8, 4  ;;  %s483_s13 = scalar_lea.hbm %s655_s4, 16  ;;  %s478_s9 = int_to_ptr.hbm [resolvable:$true] %s477_s9 }
  0x1c   : > { %s479_s10 = scalar_lea.hbm %s478_s9, 8  ;;  %p484_p0 = scmp.lt.s32.totalorder %s478_s9, %s655_s4 }
  0x1d   : > { %p480_p11 = scmp.ne.s32.totalorder %s478_s9, %s479_s10  ;;  %p485_p1 = scmp.lt.s32.totalorder %s483_s13, %s479_s10 }
  0x1f   : > { %p481_p12 = pnand %p480_p11, %p595_p5  ;;  %p486_p2 = por %p485_p1, %p484_p0 }
  0x20   : > { %251 = vperm.xlu1 %460, %v248_v4   ;;  %260 = vperm.xlu0 %459, %v245_v3  }
  0x21   : > { %462 = vset.pattern.permute.xlu2 %v531_v5  ;;  %p482_p13 = pneg %p481_p12 }
  0x22   : > { %276 = vperm.xlu2 %462, %v245_v3  }
  0x23   : > { %p487_p3 = pnand %p486_p2, %p482_p13 }
  0x28   : > { %285 = vperm.xlu1 %460, %v281_v6  }
  0x73   : > { %v271_v8 = vpop.permute.xlu2 %270 }
  0x7c   : > { %v277_v12 = vpop.permute.xlu2 %276 }
  0x7d   : > { %v279_v20 = vmul.f32 %v277_v12, %v244_v2 }
  0x8a   : > { %v266_v9 = vpop.permute.xlu1 %265  ;;  %v255_v10 = vpop.permute.xlu0 %254 }
  0x8b   : > { %v268_v13 = vsel %vm267_vm0, %v266_v9, 0.0  ;;  %v257_v14 = vsel %vm256_vm1, %v255_v10, 0.0 }
  0x8c   : > { %v273_v18 = vmul.f32 %v271_v8, %v268_v13 }
  0x92   : > { %v252_v15 = vpop.permute.xlu1 %251  ;;  %v261_v16 = vpop.permute.xlu0 %260 }
  0x93   : > { %v263_v17 = vmul.f32 %v261_v16, %v257_v14 }
  0x95   : > { %v264_v19 = vadd.f32 %v263_v17, %v252_v15 }
  0x97   : > { %v274_v21 = vadd.f32 %v273_v18, %v264_v19 }
  0x99   : > { %v280_v22 = vadd.f32 %v279_v20, %v274_v21 }
  0x9a   : > { %v286_v23 = vpop.permute.xlu1 %285 }
  0x9b   : > { %v288_v24 = vmul.f32 %v286_v23, %v280_v22  ;;  %vm282_vm2 = vcmp.gt.f32.partialorder %v280_v22, 0.0 }
  0x9d   : > { %v289_v25 = vsel %vm282_vm2, %v280_v22, %v288_v24 }
  0x9e   : > { %290 = vst [vmem:[%s227_s6] sm:$0xff] %v289_v25 }
  0x9f   : > { %490 = shalt.err (!%p487_p3)
}
  0xa0   : > { %415 = dma.vmem_to_hbm [thread:$0]  (%p595_p5), %s305_s7, 128, %s307_s8, %s292_s19  }
  0xa1 PF: > { %p421_p4 = scmp.ge.s32.totalorder %s525_s18, 2  ;;  %s318_s22 = sand.u32 1, %s513_s15  }
  0xa2   : > { %s319_s23 = scalar_lea.sflag [#allocation3], %s318_s22 }
  0xa3   : > { %p418_p7 = pnand %p421_p4, %p599_p6 }
  0xa5   : > { %p419_p8 = pneg %p418_p7 }
  0xa7   : > { %508 = dma.done.wait (%p419_p8), %s319_s23, 128  }
  0xa8   : > { %510 = vsyncadd (%p419_p8), %s319_s23, 4294967168  ;;  %p14_p9 = scmp.ge.s32.totalorder %s582_s21, 4   ;;  %s658_s15 = smov %s517_s16 }
  0xa9   : > { %s659_s16 = smov %s521_s17  ;;  %s660_s17 = smov %s593_s24 }
  0xaa   : > { %s661_s18 = smov %s582_s21  ;;  %16 = sbr.rel (!%p14_p9) target bundleno = 3 (0x3), region = 80 }
  0xaf   :  { %325 = vsyncpa [#allocation3], 1 }
  0xb0   :  { %327 = vsyncpa [#allocation3 + $0x1], 1 }

</bundles_post_ra>
